<compile_context>
chip_gen: v7x
topology: tpu7x:2x2x1
jax: 0.10.0
libtpu: 0.0.40
codegen_flags: <defaults>
</compile_context>

<pallas_src>
import functools

import jax
import jax.numpy as jnp
from jax import lax
from jax.experimental import pallas as pl
from jax.experimental.pallas import tpu as pltpu

_EPS = 1e-8  # torch.cosine_similarity default eps (v / max(||v||, eps))


def _neg_log_sigmoid(z):
    # -log(sigmoid(z)) == softplus(-z), numerically stable form.
    return jnp.maximum(-z, 0.0) + jnp.log1p(jnp.exp(-jnp.abs(z)))


def _pick_tile(b, max_tile=512):
    """Largest legal row/col tile: full batch if it fits, else a multiple of 8
    that divides b (block second-to-last dim must be a multiple of 8 or the
    full dim)."""
    if b <= max_tile:
        return b
    for t in (512, 256, 128):
        if b % t == 0:
            return t
    for t in range(max_tile, 7, -8):
        if b % t == 0:
            return t
    return b  # fall back to a single (legal) full-dim block


def _build_kernel(temperature, add_swap):
    inv_t = 1.0 / float(temperature)

    def kernel(*refs):
        if add_swap:
            x_row_ref, pos_row_ref, neg_col_ref, x_col_ref, trip_ref, pair_ref = refs
        else:
            x_row_ref, pos_row_ref, neg_col_ref, trip_ref = refs
            x_col_ref = pair_ref = None

        i = pl.program_id(0)
        j = pl.program_id(1)

        # Accumulators are resident across the whole grid: init on first step.
        @pl.when((i == 0) & (j == 0))
        def _init():
            trip_ref[...] = jnp.zeros_like(trip_ref)
            if add_swap:
                pair_ref[...] = jnp.zeros_like(pair_ref)

        xf = x_row_ref[...].astype(jnp.float32)     # (TM, D) rows i
        pf = pos_row_ref[...].astype(jnp.float32)   # (TM, D) rows i
        nf = neg_col_ref[...].astype(jnp.float32)   # (TN, D) rows j (negatives)

        # Per-row inverse norms with torch-style eps clamp.
        inv_nx = 1.0 / jnp.maximum(jnp.sqrt(jnp.sum(xf * xf, -1, keepdims=True)), _EPS)
        inv_np = 1.0 / jnp.maximum(jnp.sqrt(jnp.sum(pf * pf, -1, keepdims=True)), _EPS)
        inv_nn = 1.0 / jnp.maximum(jnp.sqrt(jnp.sum(nf * nf, -1, keepdims=True)), _EPS)

        # Contract the last (lane) dim of both operands -> no transposed copy.
        dims = (((1,), (1,)), ((), ()))

        # ---- triplet term -------------------------------------------------
        n_hat = nf * inv_nn                                             # (TN, D)
        dot_neg = lax.dot_general(xf, n_hat, dims,
                                  preferred_element_type=jnp.float32)  # (TM, TN)
        dot_pos = jnp.sum(xf * pf, -1, keepdims=True) * inv_np          # (TM, 1)
        # fold the remaining 1/||x|| and 1/T into one row rescale of the diff
        diff = (dot_pos - dot_neg) * (inv_nx * inv_t)                   # (TM, TN)
        trip_ref[...] += jnp.sum(_neg_log_sigmoid(diff))

        # ---- swap (pair) term ---------------------------------------------
        if add_swap:
            xcf = x_col_ref[...].astype(jnp.float32)                    # (TN, D) rows j
            inv_nxc = 1.0 / jnp.maximum(
                jnp.sqrt(jnp.sum(xcf * xcf, -1, keepdims=True)), _EPS)
            xc_hat = xcf * inv_nxc                                      # (TN, D)
            dot_pair = lax.dot_general(pf, xc_hat, dims,
                                       preferred_element_type=jnp.float32)  # (TM, TN)
            # diagonal of the full pair sim matrix for these rows: cos(pos_a, x_a)
            dot_diag = jnp.sum(pf * xf, -1, keepdims=True) * inv_nx     # (TM, 1)
            diff_p = (dot_diag - dot_pair) * (inv_np * inv_t)           # (TM, TN)

            tm, tn = dot_pair.shape
            gr = i * tm + lax.broadcasted_iota(jnp.int32, (tm, tn), 0)
            gc = j * tn + lax.broadcasted_iota(jnp.int32, (tm, tn), 1)
            # Excluding the diagonal == masked_fill(diag, 1e9) since
            # -log(sigmoid(1e9)) underflows to exactly 0 in f32.
            contrib = jnp.where(gr == gc, 0.0, _neg_log_sigmoid(diff_p))
            pair_ref[...] += jnp.sum(contrib)

    return kernel


def triplet_in_batch_neg_sigmoid_contrast_loss(
    text_embeddings,
    text_pos_embeddings,
    text_neg_embeddings,
    *,
    temperature: float = 0.05,
    add_swap_loss: bool = False,
    block_size: int | None = None,
):
    """JAX/Pallas equivalent of TripletInBatchNegSigmoidContrastLoss.forward."""
    x, pos, neg = text_embeddings, text_pos_embeddings, text_neg_embeddings
    B, D = x.shape
    T = int(block_size) if block_size is not None else _pick_tile(B)
    assert B % T == 0, f"batch {B} must be divisible by tile {T}"
    num_blk = B // T
    grid = (num_blk, num_blk)

    spec_row = pl.BlockSpec((T, D), lambda i, j: (i, 0))   # rows indexed by i
    spec_col = pl.BlockSpec((T, D), lambda i, j: (j, 0))   # rows indexed by j
    acc_spec = pl.BlockSpec((8, 128), lambda i, j: (0, 0))  # resident accumulator
    acc_shape = jax.ShapeDtypeStruct((8, 128), jnp.float32)

    if add_swap_loss:
        in_specs = [spec_row, spec_row, spec_col, spec_col]
        out_specs = (acc_spec, acc_spec)
        out_shape = (acc_shape, acc_shape)
        inputs = (x, pos, neg, x)
    else:
        in_specs = [spec_row, spec_row, spec_col]
        out_specs = acc_spec
        out_shape = acc_shape
        inputs = (x, pos, neg)

    itemsize = jnp.dtype(x.dtype).itemsize
    n_matmuls = 2 if add_swap_loss else 1
    cost = pl.CostEstimate(
        flops=int(2 * B * B * D * n_matmuls + 6 * B * D),
        transcendentals=int(2 * B * B * n_matmuls),
        bytes_accessed=int((4 if add_swap_loss else 3) * B * D * itemsize),
    )

    # Raise the scoped VMEM limit only when the chosen tiles actually need it
    # (double-buffered input tiles + the (T,T) f32 temporaries).
    n_in_tiles = 4 if add_swap_loss else 3
    vmem_est = 2 * n_in_tiles * T * D * itemsize + 8 * T * T * 4
    vmem_limit = None
    if vmem_est > 24 * 1024 * 1024:
        vmem_limit = int(min(2 * vmem_est, 100 * 1024 * 1024))

    kernel = _build_kernel(temperature, add_swap_loss)
    out = pl.pallas_call(
        kernel,
        grid=grid,
        in_specs=in_specs,
        out_specs=out_specs,
        out_shape=out_shape,
        compiler_params=pltpu.CompilerParams(
            dimension_semantics=("arbitrary", "arbitrary"),
            vmem_limit_bytes=vmem_limit,
        ),
        cost_estimate=cost,
    )(*inputs)

    if add_swap_loss:
        trip_acc, pair_acc = out
        loss = trip_acc[0, 0] / float(B * B) + pair_acc[0, 0] / float(B * B - B)
    else:
        loss = out[0, 0] / float(B * B)
    return loss


# ----------------------------- pure-JAX reference -----------------------------
def _normalize_ref(v):
    norm = jnp.sqrt(jnp.sum(v * v, axis=-1, keepdims=True))
    return v / jnp.maximum(norm, _EPS)


def _reference_loss(x, p, n, temperature=0.05, add_swap_loss=False):
    x, p, n = (a.astype(jnp.float32) for a in (x, p, n))
    xn, pn, nn = _normalize_ref(x), _normalize_ref(p), _normalize_ref(n)
    sim_pos = jnp.sum(xn * pn, -1) / temperature
    sim_neg = (xn @ nn.T) / temperature
    diff = sim_pos[:, None] - sim_neg
    loss = jnp.mean(-jnp.log(jax.nn.sigmoid(diff)))
    if add_swap_loss:
        B = x.shape[0]
        sim = (pn @ xn.T) / temperature
        eye = jnp.eye(B, dtype=bool)
        diag = jnp.diagonal(sim)
        d = diag[:, None] - sim
        d = jnp.where(eye, 1.0e9, d)
        loss = loss + jnp.sum(-jnp.log(jax.nn.sigmoid(d))) / (B * B - B)
    return loss


if __name__ == "__main__":
    key = jax.random.PRNGKey(0)

    # Case 1: small batch, single-tile grid (B=8, D=32).
    B, D = 8, 32
    kx, kp, kn = jax.random.split(key, 3)
    x = jax.random.normal(kx, (B, D), dtype=jnp.float32)
    pos = jax.random.normal(kp, (B, D), dtype=jnp.float32)
    neg = jax.random.normal(kn, (B, D), dtype=jnp.float32)
    for swap in (False, True):
        out = triplet_in_batch_neg_sigmoid_contrast_loss(
            x, pos, neg, temperature=0.05, add_swap_loss=swap
        )
        out = jax.block_until_ready(out)
        ref = _reference_loss(x, pos, neg, temperature=0.05, add_swap_loss=swap)
        assert jnp.allclose(out, ref, rtol=1e-5, atol=1e-5), (swap, out, ref)

    # Case 2: exercise the 2x2 tiled grid + resident accumulators (B=16, T=8).
    B2, D2 = 16, 32
    kx2, kp2, kn2 = jax.random.split(jax.random.PRNGKey(1), 3)
    x2 = jax.random.normal(kx2, (B2, D2), dtype=jnp.float32)
    pos2 = jax.random.normal(kp2, (B2, D2), dtype=jnp.float32)
    neg2 = jax.random.normal(kn2, (B2, D2), dtype=jnp.float32)
    for swap in (False, True):
        out = triplet_in_batch_neg_sigmoid_contrast_loss(
            x2, pos2, neg2, temperature=0.05, add_swap_loss=swap, block_size=8
        )
        out = jax.block_until_ready(out)
        ref = _reference_loss(x2, pos2, neg2, temperature=0.05, add_swap_loss=swap)
        assert jnp.allclose(out, ref, rtol=1e-5, atol=1e-5), (swap, out, ref)

    print("KERNEL_OK")
</pallas_src>

<mosaic_0001>
module attributes {stable_mosaic.version = 11 : i64} {
  func.func @kernel(%arg0: i32, %arg1: i32, %arg2: memref<8x32xf32, #tpu.memory_space<vmem>>, %arg3: memref<8x32xf32, #tpu.memory_space<vmem>>, %arg4: memref<8x32xf32, #tpu.memory_space<vmem>>, %arg5: memref<8x128xf32, #tpu.memory_space<vmem>>) attributes {dimension_semantics = [#tpu.dimension_semantics<arbitrary>, #tpu.dimension_semantics<arbitrary>], iteration_bounds = array<i64: 1, 1>, scalar_prefetch = 0 : i64, scratch_operands = 0 : i64, tpu.core_type = #tpu.core_type<tc>, window_params = [{transform_indices = @transform_0, window_bounds = array<i64: 8, 32>}, {transform_indices = @transform_1, window_bounds = array<i64: 8, 32>}, {transform_indices = @transform_2, window_bounds = array<i64: 8, 32>}, {pipeline_mode = #tpu.pipeline_mode<synchronous>, transform_indices = @transform_3, window_bounds = array<i64: 8, 128>}]} {
    %c0_i32 = arith.constant 0 : i32
    %0 = arith.cmpi eq, %arg0, %c0_i32 : i32
    %c0_i32_0 = arith.constant 0 : i32
    %1 = arith.cmpi eq, %arg1, %c0_i32_0 : i32
    %2 = arith.andi %0, %1 : i1
    %3 = arith.extui %2 : i1 to i32
    %c0_i32_1 = arith.constant 0 : i32
    %4 = arith.cmpi ne, %3, %c0_i32_1 : i32
    scf.if %4 {
      %cst_26 = arith.constant 0.000000e+00 : f32
      %63 = vector.broadcast %cst_26 : f32 to vector<8x128xf32>
      %c0_27 = arith.constant 0 : index
      %c0_28 = arith.constant 0 : index
      %64 = vector.load %arg5[%c0_27, %c0_28] : memref<8x128xf32, #tpu.memory_space<vmem>>, vector<8x128xf32>
      tpu.vector_store %arg5[%c0_27, %c0_28], %63 {strides = array<i32>} : memref<8x128xf32, #tpu.memory_space<vmem>>, vector<8x128xf32>,
    } else {
    }
    %c0 = arith.constant 0 : index
    %c0_2 = arith.constant 0 : index
    %5 = vector.load %arg2[%c0, %c0_2] : memref<8x32xf32, #tpu.memory_space<vmem>>, vector<8x32xf32>
    %c0_3 = arith.constant 0 : index
    %c0_4 = arith.constant 0 : index
    %6 = vector.load %arg3[%c0_3, %c0_4] : memref<8x32xf32, #tpu.memory_space<vmem>>, vector<8x32xf32>
    %c0_5 = arith.constant 0 : index
    %c0_6 = arith.constant 0 : index
    %7 = vector.load %arg4[%c0_5, %c0_6] : memref<8x32xf32, #tpu.memory_space<vmem>>, vector<8x32xf32>
    %8 = arith.mulf %5, %5 : vector<8x32xf32>
    %cst = arith.constant dense<0.000000e+00> : vector<8xf32>
    %9 = vector.multi_reduction <add>, %8, %cst [1] : vector<8x32xf32> to vector<8xf32>
    %10 = vector.shape_cast %9 : vector<8xf32> to vector<8x1xf32>
    %11 = math.sqrt %10 : vector<8x1xf32>
    %cst_7 = arith.constant 9.99999993E-9 : f32
    %12 = vector.broadcast %cst_7 : f32 to vector<8x1xf32>
    %13 = arith.maximumf %11, %12 : vector<8x1xf32>
    %cst_8 = arith.constant 1.000000e+00 : f32
    %14 = vector.broadcast %cst_8 : f32 to vector<8x1xf32>
    %15 = arith.divf %14, %13 : vector<8x1xf32>
    %16 = arith.mulf %6, %6 : vector<8x32xf32>
    %cst_9 = arith.constant dense<0.000000e+00> : vector<8xf32>
    %17 = vector.multi_reduction <add>, %16, %cst_9 [1] : vector<8x32xf32> to vector<8xf32>
    %18 = vector.shape_cast %17 : vector<8xf32> to vector<8x1xf32>
    %19 = math.sqrt %18 : vector<8x1xf32>
    %cst_10 = arith.constant 9.99999993E-9 : f32
    %20 = vector.broadcast %cst_10 : f32 to vector<8x1xf32>
    %21 = arith.maximumf %19, %20 : vector<8x1xf32>
    %cst_11 = arith.constant 1.000000e+00 : f32
    %22 = vector.broadcast %cst_11 : f32 to vector<8x1xf32>
    %23 = arith.divf %22, %21 : vector<8x1xf32>
    %24 = arith.mulf %7, %7 : vector<8x32xf32>
    %cst_12 = arith.constant dense<0.000000e+00> : vector<8xf32>
    %25 = vector.multi_reduction <add>, %24, %cst_12 [1] : vector<8x32xf32> to vector<8xf32>
    %26 = vector.shape_cast %25 : vector<8xf32> to vector<8x1xf32>
    %27 = math.sqrt %26 : vector<8x1xf32>
    %cst_13 = arith.constant 9.99999993E-9 : f32
    %28 = vector.broadcast %cst_13 : f32 to vector<8x1xf32>
    %29 = arith.maximumf %27, %28 : vector<8x1xf32>
    %cst_14 = arith.constant 1.000000e+00 : f32
    %30 = vector.broadcast %cst_14 : f32 to vector<8x1xf32>
    %31 = arith.divf %30, %29 : vector<8x1xf32>
    %32 = vector.broadcast %31 : vector<8x1xf32> to vector<8x32xf32>
    %33 = arith.mulf %7, %32 : vector<8x32xf32>
    %cst_15 = arith.constant dense<0.000000e+00> : vector<8x8xf32>
    %34 = tpu.matmul %5, %33, %cst_15 {dimension_numbers = #tpu.dot_dimension_numbers<[1], [1], [0], [0], [0, 0, 1, 0], [], []>} : vector<8x32xf32>, vector<8x32xf32>, vector<8x8xf32> -> vector<8x8xf32>
    %35 = arith.mulf %5, %6 : vector<8x32xf32>
    %cst_16 = arith.constant dense<0.000000e+00> : vector<8xf32>
    %36 = vector.multi_reduction <add>, %35, %cst_16 [1] : vector<8x32xf32> to vector<8xf32>
    %37 = vector.shape_cast %36 : vector<8xf32> to vector<8x1xf32>
    %38 = arith.mulf %37, %23 : vector<8x1xf32>
    %39 = vector.broadcast %38 : vector<8x1xf32> to vector<8x8xf32>
    %40 = arith.subf %39, %34 : vector<8x8xf32>
    %cst_17 = arith.constant 2.000000e+01 : f32
    %41 = vector.broadcast %cst_17 : f32 to vector<8x1xf32>
    %42 = arith.mulf %15, %41 : vector<8x1xf32>
    %43 = vector.broadcast %42 : vector<8x1xf32> to vector<8x8xf32>
    %44 = arith.mulf %40, %43 : vector<8x8xf32>
    %c0_18 = arith.constant 0 : index
    %c0_19 = arith.constant 0 : index
    %45 = vector.load %arg5[%c0_18, %c0_19] : memref<8x128xf32, #tpu.memory_space<vmem>>, vector<8x128xf32>
    %cst_20 = arith.constant 0.000000e+00 : f32
    %46 = vector.broadcast %cst_20 : f32 to vector<8x8xf32>
    %47 = arith.subf %46, %44 : vector<8x8xf32>
    %cst_21 = arith.constant 0.000000e+00 : f32
    %48 = vector.broadcast %cst_21 : f32 to vector<8x8xf32>
    %49 = arith.maximumf %47, %48 : vector<8x8xf32>
    %50 = math.absf %44 : vector<8x8xf32>
    %cst_22 = arith.constant 0.000000e+00 : f32
    %51 = vector.broadcast %cst_22 : f32 to vector<8x8xf32>
    %52 = arith.subf %51, %50 : vector<8x8xf32>
    %53 = math.exp %52 : vector<8x8xf32>
    %54 = math.log1p %53 : vector<8x8xf32>
    %55 = arith.addf %49, %54 : vector<8x8xf32>
    %56 = vector.shape_cast %55 : vector<8x8xf32> to vector<1x8x8xf32>
    %cst_23 = arith.constant dense<0.000000e+00> : vector<1xf32>
    %57 = vector.multi_reduction <add>, %56, %cst_23 [1, 2] : vector<1x8x8xf32> to vector<1xf32>
    %58 = vector.shape_cast %57 : vector<1xf32> to vector<1x1x1xf32>
    %59 = vector.extract %58[0, 0, 0] : f32 from vector<1x1x1xf32>
    %60 = vector.broadcast %59 : f32 to vector<8x128xf32>
    %61 = arith.addf %45, %60 : vector<8x128xf32>
    %c0_24 = arith.constant 0 : index
    %c0_25 = arith.constant 0 : index
    %62 = vector.load %arg5[%c0_24, %c0_25] : memref<8x128xf32, #tpu.memory_space<vmem>>, vector<8x128xf32>
    tpu.vector_store %arg5[%c0_24, %c0_25], %61 {strides = array<i32>} : memref<8x128xf32, #tpu.memory_space<vmem>>, vector<8x128xf32>,
    return
  }
  func.func @transform_0(%arg0: i32, %arg1: i32) -> (i32, i32) {
    %c0_i32 = arith.constant 0 : i32
    %c0_i32_0 = arith.constant 0 : i32
    return %arg0, %c0_i32 : i32, i32
  }
  func.func @transform_1(%arg0: i32, %arg1: i32) -> (i32, i32) {
    %c0_i32 = arith.constant 0 : i32
    %c0_i32_0 = arith.constant 0 : i32
    return %arg0, %c0_i32 : i32, i32
  }
  func.func @transform_2(%arg0: i32, %arg1: i32) -> (i32, i32) {
    %c0_i32 = arith.constant 0 : i32
    %c0_i32_0 = arith.constant 0 : i32
    return %arg1, %c0_i32 : i32, i32
  }
  func.func @transform_3(%arg0: i32, %arg1: i32) -> (i32, i32) {
    %c0_i32 = arith.constant 0 : i32
    %c0_i32_0 = arith.constant 0 : i32
    %c0_i32_1 = arith.constant 0 : i32
    return %c0_i32, %c0_i32_0 : i32, i32
  }
}

</mosaic_0001>

<bundles_post_ra>
// kernel: tpu_custom_call.1
= control target key start
LH: loop header
LB: loop body
LE: loop exit
PB: predicated region body
PF: predicated region fallthrough
CT: control target
= control target key end

     0   :  { %8 = vsyncpa [#allocation3], 0  ;;  %s442_s0 = inlined_call_operand.hbm [shape: f32[8,32], index: 0, kind: input, shape index: {}]   ;;  %s443_s1 = inlined_call_operand.hbm [shape: f32[8,32], index: 1, kind: input, shape index: {}]   ;;  %s444_s2 = inlined_call_operand.hbm [shape: f32[8,32], index: 2, kind: input, shape index: {}]   ;;  %s445_s3 = inlined_call_operand.hbm [shape: f32[8,128], index: 3, kind: output, shape index: {}]  }
   0x1   :  { %9 = vsyncpa [#allocation6], 0 }
   0x2   :  { %10 = vsyncpa [#allocation4], 0  ;;  %s362_s12 = smov [#allocation5]   ;;  %s363_s14 = smov [#allocation2]  }
   0x3   :  { %s27_s13 = sshll.u32 %s362_s12, 4  ;;  %s17_s15 = sshll.u32 %s363_s14, 4  ;;  %s28_s13 = int_to_ptr.vmem [resolvable:$true] %s27_s13  ;;  %s18_s15 = int_to_ptr.vmem [resolvable:$true] %s17_s15 }
   0x4   :  { %s268_s18 = scalar_lea.hbm %s443_s1, 128 }
   0x5   :  { %p269_p0 = scmp.ne.s32.totalorder %s443_s1, %s268_s18  ;;  %p272_p1 = scmp.lt.u32.totalorder %s268_s18, %s443_s1 }
   0x7   :  { %p274_p2 = pnand %p272_p1, %p269_p0 }
   0x9   :  { %277 = shalt.err (!%p274_p2)
}
   0xa   :  { %s278_s23 = scalar_lea.vmem %s28_s13, 128  ;;  %p283_p4 = scmp.lt.s32.totalorder %s28_s13, %s28_s13 }
   0xb   :  { %p279_p3 = scmp.ne.s32.totalorder %s28_s13, %s278_s23  ;;  %p284_p5 = scmp.lt.s32.totalorder %s278_s23, %s278_s23 }
   0xd   :  { %p285_p6 = por %p284_p5, %p283_p4 }
   0xf   :  { %p286_p7 = pnand %p285_p6, %p279_p3 }
  0x11   :  { %289 = shalt.err (!%p286_p7)
}
  0x12   :  { %30 = dma.hbm_to_vmem [thread:$0]  %s443_s1, 128, %s28_s13, [#allocation6]  }
  0x13   :  { %s290_s28 = scalar_lea.hbm %s442_s0, 128 }
  0x14   :  { %p291_p8 = scmp.ne.s32.totalorder %s442_s0, %s290_s28  ;;  %p294_p9 = scmp.lt.u32.totalorder %s290_s28, %s442_s0 }
  0x16   :  { %p296_p10 = pnand %p294_p9, %p291_p8 }
  0x18   :  { %299 = shalt.err (!%p296_p10)
}
  0x19   :  { %s300_s6 = scalar_lea.vmem %s18_s15, 128  ;;  %p305_p12 = scmp.lt.s32.totalorder %s18_s15, %s18_s15 }
  0x1a   :  { %p301_p11 = scmp.ne.s32.totalorder %s18_s15, %s300_s6  ;;  %p306_p13 = scmp.lt.s32.totalorder %s300_s6, %s300_s6 }
  0x1c   :  { %p307_p0 = por %p306_p13, %p305_p12 }
  0x1e   :  { %p308_p1 = pnand %p307_p0, %p301_p11 }
  0x20   :  { %311 = shalt.err (!%p308_p1)
}
  0x21   :  { %20 = dma.hbm_to_vmem [thread:$0]  %s442_s0, 128, %s18_s15, [#allocation3]  }
  0x22   :  { %s364_s8 = smov [#allocation7]   ;;  %s312_s12 = scalar_lea.hbm %s444_s2, 128 }
  0x23   :  { %s37_s9 = sshll.u32 %s364_s8, 4  ;;  %p313_p2 = scmp.ne.s32.totalorder %s444_s2, %s312_s12  ;;  %s38_s9 = int_to_ptr.vmem [resolvable:$true] %s37_s9 }
  0x24   :  { %p316_p3 = scmp.lt.u32.totalorder %s312_s12, %s444_s2 }
  0x26   :  { %p318_p4 = pnand %p316_p3, %p313_p2 }
  0x28   :  { %321 = shalt.err (!%p318_p4)
}
  0x29   :  { %s322_s18 = scalar_lea.vmem %s38_s9, 128  ;;  %p327_p6 = scmp.lt.s32.totalorder %s38_s9, %s38_s9 }
  0x2a   :  { %p323_p5 = scmp.ne.s32.totalorder %s38_s9, %s322_s18  ;;  %p328_p7 = scmp.lt.s32.totalorder %s322_s18, %s322_s18 }
  0x2c   :  { %p329_p8 = por %p328_p7, %p327_p6 }
  0x2e   :  { %p330_p9 = pnand %p329_p8, %p323_p5 }
  0x30   :  { %333 = shalt.err (!%p330_p9)
}
  0x31   :  { %40 = dma.hbm_to_vmem [thread:$0]  %s444_s2, 128, %s38_s9, [#allocation6]  }
  0x32   :  { %356 = dma.done.wait [#allocation3], 128  }
  0x33   :  { %357 = vsyncadd [#allocation3], 4294967168 }
  0x34   :  { %358 = dma.done.wait [#allocation6], 256  }
  0x35   :  { %359 = vsyncadd [#allocation6], 4294967040  ;;  %v59_v0 = vld [vmem:[#allocation7] sm:$0xff]  ;;  %vm61_vm0 = vcmask 261120   ;;  %v365_v3 = vmov 0.0   ;;  %vm366_vm1 = vmmov 0  }
  0x36   :  { %v89_v1 = vmul.f32 %v59_v0, %v59_v0  ;;  %239 = vmatprep.subr.mxu0 %v365_v3  ;;  %241 = vmatprep.mubr.msk.f32.mxu0 %vm366_vm1, %v365_v3  ;;  %v57_v4 = vld [vmem:[#allocation2] sm:$0xff]  ;;  %v58_v5 = vld [vmem:[#allocation5] sm:$0xff]  ;;  %vm205_vm9 = vcmask 64512   ;;  %s367_s2 = smov [#allocation8]  }
  0x37   :  { %v60_v6 = vmul.f32 %v57_v4, %v57_v4  ;;  %v75_v7 = vmul.f32 %v58_v5, %v58_v5  ;;  %v180_v8 = vmul.f32 %v58_v5, %v57_v4  ;;  %s225_s19 = sshll.u32 %s367_s2, 4  ;;  %s226_s19 = int_to_ptr.vmem [resolvable:$true] %s225_s19 }
  0x38   :  { %v90_v2 = vsel %vm61_vm0, %v89_v1, 0.0  ;;  %s334_s21 = scalar_lea.vmem %s226_s19, 128  ;;  %p339_p11 = scmp.lt.s32.totalorder %s226_s19, %s226_s19 }
  0x39   :  { %91 = vadd.xlane.f32.xlu0 %v90_v2  ;;  %v62_v9 = vsel %vm61_vm0, %v60_v6, 0.0  ;;  %v76_v10 = vsel %vm61_vm0, %v75_v7, 0.0  ;;  %v181_v11 = vsel %vm61_vm0, %v180_v8, 0.0  ;;  %p335_p10 = scmp.ne.s32.totalorder %s226_s19, %s334_s21  ;;  %p340_p12 = scmp.lt.s32.totalorder %s334_s21, %s334_s21 }
  0x3a   :  { %63 = vadd.xlane.f32.xlu1 %v62_v9 }
  0x3b   :  { %p341_p13 = por %p340_p12, %p339_p11 }
  0x3d   :  { %77 = vadd.xlane.f32.xlu0 %v76_v10  ;;  %p342_p0 = pnand %p341_p13, %p335_p10 }
  0x3e   :  { %182 = vadd.xlane.f32.xlu1 %v181_v11 }
  0xc6   :  { %v92_v12 = vpop.xlane.xlu0 %91 }
  0xc7   :  { %252 = vrsqrt.f32 %v92_v12  ;;  %vm95_vm2 = vcmp.eq.f32.partialorder %v92_v12, inf  ;;  %v98_v15 = vand.u32 2147483648, %v92_v12  ;;  %vm97_vm3 = vcmp.eq.f32.partialorder %v92_v12, 0.0  ;;  %v64_v22 = vpop.xlane.xlu1 %63 }
  0xc8   :  { %vm67_vm5 = vcmp.eq.f32.partialorder %v64_v22, inf  ;;  %v70_v29 = vand.u32 2147483648, %v64_v22  ;;  %vm69_vm7 = vcmp.eq.f32.partialorder %v64_v22, 0.0 }
  0xca   :  { %v78_v21 = vpop.xlane.xlu0 %77 }
  0xcb   :  { %vm81_vm4 = vcmp.eq.f32.partialorder %v78_v21, inf  ;;  %v84_v27 = vand.u32 2147483648, %v78_v21  ;;  %vm83_vm6 = vcmp.eq.f32.partialorder %v78_v21, 0.0  ;;  %v183_v36 = vpop.xlane.xlu1 %182 }
  0xd1   :  { %v253_v13 = vpop.eup %252 }
  0xd2   :  { %v94_v14 = vmul.f32 %v253_v13, %v92_v12 }
  0xd4   :  { %v96_v16 = vsel %vm95_vm2, %v92_v12, %v94_v14 }
  0xd5   :  { %v99_v17 = vsel %vm97_vm3, %v98_v15, %v96_v16 }
  0xd6   :  { %v100_v18 = vmax.f32 %v99_v17, 1e-08 }
  0xd8   :  { %254 = vrcp.f32 %v100_v18 }
  0xd9   :  { %256 = vrsqrt.f32 %v78_v21 }
  0xda   :  { %258 = vrsqrt.f32 %v64_v22 }
  0xe2   :  { %v255_v19 = vpop.eup %254 }
  0xe3   :  { %v103_v20 = vmul.f32 %v255_v19, %v59_v0  ;;  %v257_v23 = vpop.eup %256 }
  0xe4   :  { %v259_v24 = vpop.eup %258  ;;  %v80_v25 = vmul.f32 %v257_v23, %v78_v21 }
  0xe5   :  { %240 = vmatpush3.xpose.msk.msra.mxu0 %vm61_vm0, %v103_v20  ;;  %v66_v26 = vmul.f32 %v259_v24, %v64_v22 }
  0xe6   :  { %v82_v28 = vsel %vm81_vm4, %v78_v21, %v80_v25 }
  0xe7   :  { %v68_v30 = vsel %vm67_vm5, %v64_v22, %v66_v26  ;;  %v85_v31 = vsel %vm83_vm6, %v84_v27, %v82_v28 }
  0xe8   :  { %242 = vmatmul.mubr.msk.f32.vlgmr.msra.gmra.mrb[0].mxu0 %vm61_vm0, %v57_v4  ;;  %v71_v32 = vsel %vm69_vm7, %v70_v29, %v68_v30  ;;  %v86_v33 = vmax.f32 %v85_v31, 1e-08 }
  0xe9   :  { %v72_v34 = vmax.f32 %v71_v32, 1e-08 }
  0xea   :  { %260 = vrcp.f32 %v86_v33 }
  0xeb   :  { %262 = vrcp.f32 %v72_v34 }
  0xf4   :  { %v261_v35 = vpop.eup %260 }
  0xf5   :  { %v263_v37 = vpop.eup %262  ;;  %v184_v38 = vmul.f32 %v261_v35, %v183_v36 }
  0xf6   :  { %v186_v41 = vmul.f32 20.0, %v263_v37 }
 0x1bb   :  { %v176_v39 = vpop.f32.mrb[0].mxu0 }
 0x1bc   :  { %v185_v40 = vsub.f32 %v184_v38, %v176_v39  ;;  %v243_v42 = vpop.f32.mrb[1].mxu0 }
 0x1be   :  { %v187_v43 = vmul.f32 %v186_v41, %v185_v40 }
 0x1c0   :  { %v191_v44 = vand.u32 2147483647, %v187_v43  ;;  %v189_v51 = vsub.f32 0.0, %v187_v43 }
 0x1c2   :  { %v192_v45 = vsub.f32 0.0, %v191_v44  ;;  %v190_v56 = vmax.f32 %v189_v51, 0.0 }
 0x1c4   :  { %v193_v46 = vmul.f32 1.442695, %v192_v45 }
 0x1c6   :  { %264 = vpow2.f32 %v193_v46 }
 0x1d0   :  { %v265_v47 = vpop.eup %264 }
 0x1d1   :  { %v195_v48 = vadd.f32 1.0, %v265_v47  ;;  %v198_v49 = vmul.f32 -0.5, %v265_v47  ;;  %v201_v52 = vand.u32 2147483647, %v265_v47 }
 0x1d3   :  { %266 = vlog2.f32 %v195_v48  ;;  %v199_v50 = vadd.f32 1.0, %v198_v49  ;;  %vm202_vm8 = vcmp.lt.f32.partialorder %v201_v52, 0.0004427343 }
 0x1d5   :  { %v200_v55 = vmul.f32 %v265_v47, %v199_v50 }
 0x1dd   :  { %v267_v53 = vpop.eup %266 }
 0x1de   :  { %v197_v54 = vmul.f32 0.6931472, %v267_v53 }
 0x1e0   :  { %v203_v57 = vsel %vm202_vm8, %v200_v55, %v197_v54 }
 0x1e1   :  { %v204_v58 = vadd.f32 %v203_v57, %v190_v56 }
 0x1e3   :  { %v206_v59 = vsel %vm205_vm9, %v204_v58, 0.0 }
 0x1e4   :  { %207 = vadd.xlane.f32.xlu0 %v206_v59 }
 0x271   :  { %v208_v60 = vpop.xlane.xlu0 %207 }
 0x272   :  { %v209_v61 = vrot.slane %v208_v60, 4 }
 0x274   :  { %v210_v62 = vadd.f32 %v209_v61, %v208_v60 }
 0x276   :  { %v211_v63 = vrot.slane %v210_v62, 2 }
 0x278   :  { %v212_v0 = vadd.f32 %v211_v63, %v210_v62 }
 0x27a   :  { %v213_v1 = vrot.slane %v212_v0, 1 }
 0x27c   :  { %v214_v2 = vadd.f32 %v213_v1, %v212_v0 }
 0x27e   :  { %244 = vpush %v214_v2 }
 0x2af   :  { %s245_s20 = spop %244 }
 0x2b0   :  { %v216_v3 = vstv %s245_s20 }
 0x2b1   :  { %218 = vst [vmem:[#allocation8] sm:$0xff] %v216_v3 }
 0x2b2   :  { %345 = shalt.err (!%p342_p0)
}
 0x2b3   :  { %s346_s24 = scalar_lea.hbm %s445_s3, 128 }
 0x2b4   :  { %p347_p1 = scmp.ne.s32.totalorder %s445_s3, %s346_s24  ;;  %p350_p2 = scmp.lt.u32.totalorder %s346_s24, %s445_s3 }
 0x2b6   :  { %p352_p3 = pnand %p350_p2, %p347_p1 }
 0x2b8   :  { %355 = shalt.err (!%p352_p3)
}
 0x2b9   :  { %228 = dma.vmem_to_hbm [thread:$0]  %s226_s19, 128, %s445_s3, [#allocation4]  }
 0x2ba   :  { %360 = dma.done.wait [#allocation4], 128  }
 0x2bb   :  { %361 = vsyncadd [#allocation4], 4294967168 }
 0x2bc   :  { %232 = vsyncpa [#allocation3], 1 }
 0x2bd   :  { %233 = vsyncpa [#allocation6], 1 }
 0x2be   :  { %234 = vsyncpa [#allocation4], 1 }

</bundles_post_ra>
